<compile_context>
chip_gen: v7x
topology: tpu7x:2x2x1
jax: 0.10.0
libtpu: 0.0.40
codegen_flags: <defaults>
</compile_context>

<pallas_src>
import functools

import jax
import jax.numpy as jnp
import numpy as np
from jax import lax
from jax.experimental import pallas as pl
from jax.experimental.pallas import tpu as pltpu

EPS = 1e-5
KH = KW = 3  # 3x3 conv, stride 1, padding 1


def _round_up(x, m):
    return (x + m - 1) // m * m


def _gblock_kernel(x_ref, w_ref, m_ref, o_ref, col_ref, *, wp, n_valid):
    # x_ref:   (1, Cin_p, L)       one image, channels-major, zero-padded + flattened spatial
    # w_ref:   (Cout_p, 9*Cin_p)   tap-major packed conv weight
    # m_ref:   (1, L)              1.0 on valid output positions, 0.0 on padding
    # o_ref:   (1, Cout_p, L)      output (wrapper crops back to (Cout, H, W))
    # col_ref: (9*Cin_p, L)        f32 scratch: rolled "im2col" stack
    cin_p = x_ref.shape[1]
    L = x_ref.shape[2]

    x = x_ref[0]  # (Cin_p, L)

    # Build the 9-tap stack with lane rotations (XLU slot) - no strided slices/reshapes.
    for dy in range(KH):
        for dx in range(KW):
            t = dy * KW + dx
            off = dy * wp + dx  # flat offset of tap (dy, dx) within the padded image
            shifted = x if off == 0 else pltpu.roll(x, shift=L - off, axis=1)
            col_ref[t * cin_p:(t + 1) * cin_p, :] = shifted

    # Conv2d(3x3) as a single MXU contraction over K = 9*Cin_p.
    acc = jnp.dot(w_ref[...], col_ref[...],
                  preferred_element_type=jnp.float32)  # (Cout_p, L)
    # (conv bias intentionally omitted: exactly cancelled by the mean subtraction below)

    # InstanceNorm2d (affine=False, biased variance) over the valid H*W positions only.
    mask = m_ref[...]                                   # (1, L), broadcasts over channels
    inv_n = 1.0 / n_valid
    mean = jnp.sum(acc * mask, axis=1, keepdims=True) * inv_n     # (Cout_p, 1)
    cen = acc - mean
    var = jnp.sum(cen * cen * mask, axis=1, keepdims=True) * inv_n
    y = cen * lax.rsqrt(var + EPS)                      # rsqrt -> EUP slot (free-ish)

    # ReLU, zero the padded positions, lane-dense store.
    o_ref[0] = (jnp.maximum(y, 0.0) * mask).astype(o_ref.dtype)


def gblock_forward(x_nchw, w_oihw, bias=None):
    """GBlock forward: Conv2d(3x3, s=1, p=1) -> InstanceNorm2d -> ReLU.  NCHW in/out.

    `bias` is accepted for API parity with nn.Conv2d but unused: a per-channel conv
    bias is exactly cancelled by InstanceNorm2d(affine=False)'s mean subtraction.
    """
    del bias
    N, Cin, H, W = x_nchw.shape
    Cout = w_oihw.shape[0]
    Hp, Wp = H + 2, W + 2

    # Align channels to the 8-sublane granule and the flattened spatial axis to 128 lanes.
    cin_p = _round_up(Cin, 8)
    cout_p = _round_up(Cout, 8)
    L = _round_up(Hp * Wp, 128)

    # Channels-major input: zero-pad spatial by 1, flatten spatial, pad channels / lanes.
    x_pad = jnp.pad(
        x_nchw, ((0, 0), (0, cin_p - Cin), (1, 1), (1, 1))
    ).reshape(N, cin_p, Hp * Wp)
    x_flat = jnp.pad(x_pad, ((0, 0), (0, 0), (0, L - Hp * Wp)))

    # Tap-major packed weight: (Cout_p, 9*Cin_p), column = (dy*KW + dx)*Cin_p + cin.
    w_p = jnp.pad(w_oihw, ((0, cout_p - Cout), (0, cin_p - Cin), (0, 0), (0, 0)))
    w_packed = jnp.transpose(w_p, (0, 2, 3, 1)).reshape(cout_p, KH * KW * cin_p)

    # Validity mask over the flattened padded spatial axis (valid <=> an output pixel).
    p = np.arange(L)
    mask_np = ((p < Hp * Wp) & (p // Wp < H) & (p % Wp < W)).astype(np.float32)
    mask = jnp.asarray(mask_np).reshape(1, L)

    kernel = functools.partial(_gblock_kernel, wp=Wp, n_valid=H * W)

    # TODO(synk): for production GBlock shapes (e.g. 256x256, 64/128 ch) tile H with a
    # 2-row halo + two-pass norm and set vmem_limit_bytes explicitly (v7x has only
    # 64 MiB VMEM); bf16 matmul inputs (f32 stats) are a further win on v6e/v7x.
    out_full = pl.pallas_call(
        kernel,
        out_shape=jax.ShapeDtypeStruct((N, cout_p, L), x_nchw.dtype),
        grid=(N,),
        in_specs=[
            pl.BlockSpec((1, cin_p, L), lambda n: (n, 0, 0)),
            pl.BlockSpec((cout_p, KH * KW * cin_p), lambda n: (0, 0)),
            pl.BlockSpec((1, L), lambda n: (0, 0)),
        ],
        out_specs=pl.BlockSpec((1, cout_p, L), lambda n: (n, 0, 0)),
        scratch_shapes=[pltpu.VMEM((KH * KW * cin_p, L), jnp.float32)],
        compiler_params=pltpu.CompilerParams(
            dimension_semantics=("parallel",),
        ),
    )(x_flat, w_packed, mask)

    # Crop padded channels / spatial back to (N, Cout, H, W).  No transposes needed.
    out = out_full[:, :Cout, : Hp * Wp].reshape(N, Cout, Hp, Wp)[:, :, :H, :W]
    return out


def _reference(x_nchw, w_oihw, bias):
    """Pure-JAX reference: Conv2d(+bias) -> InstanceNorm2d -> ReLU (NCHW)."""
    y = lax.conv_general_dilated(
        x_nchw, w_oihw,
        window_strides=(1, 1), padding=((1, 1), (1, 1)),
        dimension_numbers=("NCHW", "OIHW", "NCHW"),
    ) + bias.reshape(1, -1, 1, 1)
    mean = jnp.mean(y, axis=(2, 3), keepdims=True)
    var = jnp.mean((y - mean) ** 2, axis=(2, 3), keepdims=True)
    y = (y - mean) * lax.rsqrt(var + EPS)
    return jnp.maximum(y, 0.0)


if __name__ == "__main__":
    # Small shapes consistent with the module: batch=2, Cin=4, Cout=8, 16x16 spatial.
    N, Cin, Cout, H, W = 2, 4, 8, 16, 16

    key = jax.random.PRNGKey(0)
    kx, kw, kb = jax.random.split(key, 3)
    x = jax.random.normal(kx, (N, Cin, H, W), dtype=jnp.float32)
    # Deterministic synthetic parameters (shapes per nn.Conv2d(Cin, Cout, 3, 1, 1)).
    w = jax.random.normal(kw, (Cout, Cin, KH, KW), dtype=jnp.float32) * 0.1
    b = jax.random.normal(kb, (Cout,), dtype=jnp.float32) * 0.1

    out = gblock_forward(x, w, b)
    jax.block_until_ready(out)

    ref = _reference(x, w, b)
    assert out.shape == (N, Cout, H, W), out.shape
    assert jnp.allclose(out, ref, atol=1e-3, rtol=1e-3), float(jnp.max(jnp.abs(out - ref)))

    print("KERNEL_OK")
</pallas_src>

<mosaic_0001>
module attributes {stable_mosaic.version = 11 : i64} {
  func.func @_gblock_kernel(%arg0: i32, %arg1: memref<1x8x384xf32, #tpu.memory_space<vmem>>, %arg2: memref<8x72xf32, #tpu.memory_space<vmem>>, %arg3: memref<1x384xf32, #tpu.memory_space<vmem>>, %arg4: memref<1x8x384xf32, #tpu.memory_space<vmem>>, %arg5: memref<72x384xf32, #tpu.memory_space<vmem>>) attributes {dimension_semantics = [#tpu.dimension_semantics<parallel>], iteration_bounds = array<i64: 2>, scalar_prefetch = 0 : i64, scratch_operands = 1 : i64, tpu.core_type = #tpu.core_type<tc>, window_params = [{transform_indices = @transform_0, window_bounds = array<i64: 1, 8, 384>}, {pipeline_mode = #tpu.pipeline_mode<synchronous>, transform_indices = @transform_1, window_bounds = array<i64: 8, 72>}, {pipeline_mode = #tpu.pipeline_mode<synchronous>, transform_indices = @transform_2, window_bounds = array<i64: 1, 384>}, {transform_indices = @transform_3, window_bounds = array<i64: 1, 8, 384>}]} {
    %c0 = arith.constant 0 : index
    %c0_0 = arith.constant 0 : index
    %c0_1 = arith.constant 0 : index
    %0 = vector.load %arg1[%c0, %c0_0, %c0_1] : memref<1x8x384xf32, #tpu.memory_space<vmem>>, vector<1x8x384xf32>
    %1 = vector.shape_cast %0 : vector<1x8x384xf32> to vector<8x384xf32>
    %c0_2 = arith.constant 0 : index
    %c0_3 = arith.constant 0 : index
    %2 = vector.load %arg5[%c0_2, %c0_3] : memref<72x384xf32, #tpu.memory_space<vmem>>, vector<8x384xf32>
    tpu.vector_store %arg5[%c0_2, %c0_3], %1 {strides = array<i32>} : memref<72x384xf32, #tpu.memory_space<vmem>>, vector<8x384xf32>,
    %c383_i32 = arith.constant 383 : i32
    %3 = tpu.dynamic_rotate %1 by %c383_i32 dim 1 : vector<8x384xf32>, i32 -> vector<8x384xf32>
    %c8 = arith.constant 8 : index
    %c0_4 = arith.constant 0 : index
    %4 = vector.load %arg5[%c8, %c0_4] : memref<72x384xf32, #tpu.memory_space<vmem>>, vector<8x384xf32>
    tpu.vector_store %arg5[%c8, %c0_4], %3 {strides = array<i32>} : memref<72x384xf32, #tpu.memory_space<vmem>>, vector<8x384xf32>,
    %c382_i32 = arith.constant 382 : i32
    %5 = tpu.dynamic_rotate %1 by %c382_i32 dim 1 : vector<8x384xf32>, i32 -> vector<8x384xf32>
    %c16 = arith.constant 16 : index
    %c0_5 = arith.constant 0 : index
    %6 = vector.load %arg5[%c16, %c0_5] : memref<72x384xf32, #tpu.memory_space<vmem>>, vector<8x384xf32>
    tpu.vector_store %arg5[%c16, %c0_5], %5 {strides = array<i32>} : memref<72x384xf32, #tpu.memory_space<vmem>>, vector<8x384xf32>,
    %c366_i32 = arith.constant 366 : i32
    %7 = tpu.dynamic_rotate %1 by %c366_i32 dim 1 : vector<8x384xf32>, i32 -> vector<8x384xf32>
    %c24 = arith.constant 24 : index
    %c0_6 = arith.constant 0 : index
    %8 = vector.load %arg5[%c24, %c0_6] : memref<72x384xf32, #tpu.memory_space<vmem>>, vector<8x384xf32>
    tpu.vector_store %arg5[%c24, %c0_6], %7 {strides = array<i32>} : memref<72x384xf32, #tpu.memory_space<vmem>>, vector<8x384xf32>,
    %c365_i32 = arith.constant 365 : i32
    %9 = tpu.dynamic_rotate %1 by %c365_i32 dim 1 : vector<8x384xf32>, i32 -> vector<8x384xf32>
    %c32 = arith.constant 32 : index
    %c0_7 = arith.constant 0 : index
    %10 = vector.load %arg5[%c32, %c0_7] : memref<72x384xf32, #tpu.memory_space<vmem>>, vector<8x384xf32>
    tpu.vector_store %arg5[%c32, %c0_7], %9 {strides = array<i32>} : memref<72x384xf32, #tpu.memory_space<vmem>>, vector<8x384xf32>,
    %c364_i32 = arith.constant 364 : i32
    %11 = tpu.dynamic_rotate %1 by %c364_i32 dim 1 : vector<8x384xf32>, i32 -> vector<8x384xf32>
    %c40 = arith.constant 40 : index
    %c0_8 = arith.constant 0 : index
    %12 = vector.load %arg5[%c40, %c0_8] : memref<72x384xf32, #tpu.memory_space<vmem>>, vector<8x384xf32>
    tpu.vector_store %arg5[%c40, %c0_8], %11 {strides = array<i32>} : memref<72x384xf32, #tpu.memory_space<vmem>>, vector<8x384xf32>,
    %c348_i32 = arith.constant 348 : i32
    %13 = tpu.dynamic_rotate %1 by %c348_i32 dim 1 : vector<8x384xf32>, i32 -> vector<8x384xf32>
    %c48 = arith.constant 48 : index
    %c0_9 = arith.constant 0 : index
    %14 = vector.load %arg5[%c48, %c0_9] : memref<72x384xf32, #tpu.memory_space<vmem>>, vector<8x384xf32>
    tpu.vector_store %arg5[%c48, %c0_9], %13 {strides = array<i32>} : memref<72x384xf32, #tpu.memory_space<vmem>>, vector<8x384xf32>,
    %c347_i32 = arith.constant 347 : i32
    %15 = tpu.dynamic_rotate %1 by %c347_i32 dim 1 : vector<8x384xf32>, i32 -> vector<8x384xf32>
    %c56 = arith.constant 56 : index
    %c0_10 = arith.constant 0 : index
    %16 = vector.load %arg5[%c56, %c0_10] : memref<72x384xf32, #tpu.memory_space<vmem>>, vector<8x384xf32>
    tpu.vector_store %arg5[%c56, %c0_10], %15 {strides = array<i32>} : memref<72x384xf32, #tpu.memory_space<vmem>>, vector<8x384xf32>,
    %c346_i32 = arith.constant 346 : i32
    %17 = tpu.dynamic_rotate %1 by %c346_i32 dim 1 : vector<8x384xf32>, i32 -> vector<8x384xf32>
    %c64 = arith.constant 64 : index
    %c0_11 = arith.constant 0 : index
    %18 = vector.load %arg5[%c64, %c0_11] : memref<72x384xf32, #tpu.memory_space<vmem>>, vector<8x384xf32>
    tpu.vector_store %arg5[%c64, %c0_11], %17 {strides = array<i32>} : memref<72x384xf32, #tpu.memory_space<vmem>>, vector<8x384xf32>,
    %c0_12 = arith.constant 0 : index
    %c0_13 = arith.constant 0 : index
    %19 = vector.load %arg2[%c0_12, %c0_13] : memref<8x72xf32, #tpu.memory_space<vmem>>, vector<8x72xf32>
    %c0_14 = arith.constant 0 : index
    %c0_15 = arith.constant 0 : index
    %20 = vector.load %arg5[%c0_14, %c0_15] : memref<72x384xf32, #tpu.memory_space<vmem>>, vector<72x384xf32>
    %cst = arith.constant dense<0.000000e+00> : vector<8x384xf32>
    %21 = tpu.matmul %19, %20, %cst {dimension_numbers = #tpu.dot_dimension_numbers<[1], [0], [0], [1], [0, 0, 1, 1], [], []>} : vector<8x72xf32>, vector<72x384xf32>, vector<8x384xf32> -> vector<8x384xf32>
    %c0_16 = arith.constant 0 : index
    %c0_17 = arith.constant 0 : index
    %22 = vector.load %arg3[%c0_16, %c0_17] : memref<1x384xf32, #tpu.memory_space<vmem>>, vector<1x384xf32>
    %23 = vector.broadcast %22 : vector<1x384xf32> to vector<8x384xf32>
    %24 = arith.mulf %21, %23 : vector<8x384xf32>
    %cst_18 = arith.constant dense<0.000000e+00> : vector<8xf32>
    %25 = vector.multi_reduction <add>, %24, %cst_18 [1] : vector<8x384xf32> to vector<8xf32>
    %26 = vector.shape_cast %25 : vector<8xf32> to vector<8x1xf32>
    %cst_19 = arith.constant 3.906250e-03 : f32
    %27 = vector.broadcast %cst_19 : f32 to vector<8x1xf32>
    %28 = arith.mulf %26, %27 : vector<8x1xf32>
    %29 = vector.broadcast %28 : vector<8x1xf32> to vector<8x384xf32>
    %30 = arith.subf %21, %29 : vector<8x384xf32>
    %31 = arith.mulf %30, %30 : vector<8x384xf32>
    %32 = vector.broadcast %22 : vector<1x384xf32> to vector<8x384xf32>
    %33 = arith.mulf %31, %32 : vector<8x384xf32>
    %cst_20 = arith.constant dense<0.000000e+00> : vector<8xf32>
    %34 = vector.multi_reduction <add>, %33, %cst_20 [1] : vector<8x384xf32> to vector<8xf32>
    %35 = vector.shape_cast %34 : vector<8xf32> to vector<8x1xf32>
    %cst_21 = arith.constant 3.906250e-03 : f32
    %36 = vector.broadcast %cst_21 : f32 to vector<8x1xf32>
    %37 = arith.mulf %35, %36 : vector<8x1xf32>
    %cst_22 = arith.constant 9.99999974E-6 : f32
    %38 = vector.broadcast %cst_22 : f32 to vector<8x1xf32>
    %39 = arith.addf %37, %38 : vector<8x1xf32>
    %40 = math.rsqrt %39 : vector<8x1xf32>
    %41 = vector.broadcast %40 : vector<8x1xf32> to vector<8x384xf32>
    %42 = arith.mulf %30, %41 : vector<8x384xf32>
    %cst_23 = arith.constant 0.000000e+00 : f32
    %43 = vector.broadcast %cst_23 : f32 to vector<8x384xf32>
    %44 = arith.maximumf %42, %43 : vector<8x384xf32>
    %45 = vector.broadcast %22 : vector<1x384xf32> to vector<8x384xf32>
    %46 = arith.mulf %44, %45 : vector<8x384xf32>
    %c0_24 = arith.constant 0 : index
    %c0_25 = arith.constant 0 : index
    %c0_26 = arith.constant 0 : index
    %47 = vector.load %arg4[%c0_24, %c0_25, %c0_26] : memref<1x8x384xf32, #tpu.memory_space<vmem>>, vector<1x8x384xf32>
    %48 = vector.shape_cast %47 : vector<1x8x384xf32> to vector<8x384xf32>
    %49 = vector.shape_cast %46 : vector<8x384xf32> to vector<1x8x384xf32>
    tpu.vector_store %arg4[%c0_24, %c0_25, %c0_26], %49 {strides = array<i32>} : memref<1x8x384xf32, #tpu.memory_space<vmem>>, vector<1x8x384xf32>,
    return
  }
  func.func @transform_0(%arg0: i32) -> (i32, i32, i32) {
    %c0_i32 = arith.constant 0 : i32
    %c0_i32_0 = arith.constant 0 : i32
    %c0_i32_1 = arith.constant 0 : i32
    return %arg0, %c0_i32, %c0_i32_0 : i32, i32, i32
  }
  func.func @transform_1(%arg0: i32) -> (i32, i32) {
    %c0_i32 = arith.constant 0 : i32
    %c0_i32_0 = arith.constant 0 : i32
    %c0_i32_1 = arith.constant 0 : i32
    return %c0_i32, %c0_i32_0 : i32, i32
  }
  func.func @transform_2(%arg0: i32) -> (i32, i32) {
    %c0_i32 = arith.constant 0 : i32
    %c0_i32_0 = arith.constant 0 : i32
    %c0_i32_1 = arith.constant 0 : i32
    return %c0_i32, %c0_i32_0 : i32, i32
  }
  func.func @transform_3(%arg0: i32) -> (i32, i32, i32) {
    %c0_i32 = arith.constant 0 : i32
    %c0_i32_0 = arith.constant 0 : i32
    %c0_i32_1 = arith.constant 0 : i32
    return %arg0, %c0_i32, %c0_i32_0 : i32, i32, i32
  }
}

</mosaic_0001>

<bundles_post_ra>
// kernel: tpu_custom_call.1
= control target key start
LH: loop header
LB: loop body
LE: loop exit
PB: predicated region body
PF: predicated region fallthrough
CT: control target
= control target key end

     0   :  { %8 = vsyncpa [#allocation4], 0  ;;  %s1216_s0 = inlined_call_operand.hbm [shape: f32[2,8,384], index: 0, kind: input, shape index: {}]   ;;  %s1217_s1 = inlined_call_operand.hbm [shape: f32[8,72], index: 1, kind: input, shape index: {}]   ;;  %s1218_s2 = inlined_call_operand.vmem [shape: f32[1,384], index: 2, kind: input, shape index: {}]   ;;  %s1219_s3 = inlined_call_operand.hbm [shape: f32[2,8,384], index: 3, kind: output, shape index: {}]  }
   0x1   :  { %10 = vsyncpa [#allocation4 + $0x1], 0 }
   0x2   :  { %11 = vsyncpa [#allocation7], 0 }
   0x3   :  { %12 = vsyncpa [#allocation5], 0 }
   0x4   :  { %14 = vsyncpa [#allocation5 + $0x1], 0  ;;  %s977_s12 = smov 0   ;;  %s979_s13 = smov 0  }
   0x5   :  { %s981_s14 = smov 0   ;;  %s983_s15 = smov 0  }
   0x6 LB: > { %s998_s16 = sadd.s32 4294967295, %s941_s15   ;;  %s633_s17 = sadd.s32 4294967294, %s941_s15   ;;  %s941_s15 = sphi %s983_s15, %s1243_s15   ;;  %s937_s14 = sphi %s981_s14, %s1242_s14   ;;  %s933_s13 = sphi %s979_s13, %s1241_s13   ;;  %s929_s12 = sphi %s977_s12, %s1240_s12  }
   0x7   : > { %p40_p0 = scmp.ne.s32.totalorder %s933_s13, %s929_s12  ;;  %p1220_p1 = scmp.eq.s32.totalorder %s998_s16, 0 }
   0x8   : > { %p112_p3 = scmp.eq.s32.totalorder %s633_s17, 1  ;;  %p634_p5 = scmp.ge.s32.totalorder %s941_s15, 1 }
   0x9   : > { %p1007_p4 = por %p1220_p1, %p40_p0  ;;  %p119_p7 = scmp.lt.s32.totalorder %s941_s15, 3 }
   0xa   : > { %p1012_p6 = por %p112_p3, %p40_p0  ;;  %s943_s21 = smov [#allocation6]  }
   0xb   : > { %s1223_s18 = scalar_select %p1007_p4, 1, 0 }
   0xc   : > { %s1224_s19 = scalar_select %p1012_p6, 1, 0 }
   0xd   : > { %p1017_p8 = pnand %p634_p5, %p119_p7  ;;  %s132_s22 = sshll.u32 %s943_s21, 4  ;;  %s133_s22 = int_to_ptr.vmem [resolvable:$true] %s132_s22 }
   0xe   : > { %s1025_s23 = sadd.s32 1, %s941_s15   ;;  %s27_s27 = sadd.s32 1, %s937_s14 }
   0xf   : > { %s1225_s20 = scalar_select %p1017_p8, 1, 0 }
  0x10   : > { %p716_p10 = pneg %p1017_p8  ;;  %s24_s25 = ssub.s32 %s941_s15, %s1025_s23 }
  0x11   : > { %p1035_p12 = scmp.eq.s32.totalorder %s24_s25, 0  ;;  %s813_s30 = scalar_lea.hbm %s1217_s1, 128 }
  0x12   : > { %p1029_p11 = pnand %p716_p10, %p1220_p1  ;;  %p814_p0 = scmp.ne.s32.totalorder %s1217_s1, %s813_s30 }
  0x13   : > { %s1227_s26 = scalar_select %p1035_p12, 1, 0 }
  0x14   : > { %p815_p3 = pneg %p1029_p11  ;;  %p820_p10 = scmp.lt.u32.totalorder %s813_s30, %s1217_s1 }
  0x16   : > { %p816_p5 = pnand %p815_p3, %p814_p0 }
  0x18   : > { %p817_p7 = pneg %p816_p5 }
  0x1a   : > { %p822_p9 = pnand %p820_p10, %p817_p7 }
  0x1c   : > { %825 = shalt.err (!%p822_p9)
}
  0x1d   : > { %s826_s8 = scalar_lea.vmem %s133_s22, 128  ;;  %p834_p6 = scmp.lt.s32.totalorder %s133_s22, %s133_s22 }
  0x1e   : > { %p827_p1 = scmp.ne.s32.totalorder %s133_s22, %s826_s8  ;;  %p835_p4 = scmp.lt.s32.totalorder %s826_s8, %s826_s8 }
  0x20   : > { %p829_p2 = pnand %p827_p1, %p815_p3  ;;  %p836_p8 = por %p835_p4, %p834_p6 }
  0x22   : > { %p830_p13 = pneg %p829_p2 }
  0x24   : > { %p837_p12 = pnand %p836_p8, %p830_p13 }
  0x26   : > { %840 = shalt.err (!%p837_p12)
}
  0x27   : > { %719 = dma.hbm_to_vmem [thread:$0]  (!%p1029_p11), %s1217_s1, 128, %s133_s22, [#allocation7]  }
  0x28   : > { %p1228_p1 = scmp.ne.s32.totalorder %s1227_s26, 0  ;;  %p35_p2 = scmp.eq.s32.totalorder %s941_s15, 0 }
  0x29   : > { %p1229_p4 = scmp.ne.s32.totalorder %s937_s14, %s933_s13  ;;  %p1230_p6 = scmp.eq.s32.totalorder %s998_s16, 1 }
  0x2a   : > { %s1061_s11 = scalar_select %p1228_p1, %s937_s14, %s27_s27  }
  0x2b   : > { %p1069_p8 = por %p1230_p6, %p1229_p4  ;;  %p729_p9 = scmp.lt.s32.totalorder %s941_s15, 2 }
  0x2c   : > { %s146_s21 = sand.u32 1, %s937_s14   ;;  %p1232_p12 = pmov %p1229_p4 }
  0x2d   : > { %s704_s24 = smul.u32 24, %s146_s21  ;;  %s147_s4 = scalar_lea.sflag [#allocation4], %s146_s21 }
  0x2e   : > { %p36_p13 = por %p35_p2, %p1232_p12  ;;  %s705_s25 = smul.u32 384, %s941_s15 }
  0x2f   : > { %s150_s29 = scalar_lea.vmem [#allocation3], %s704_s24  ;;  %s846_s8 = scalar_lea.hbm %s1216_s0, 768 }
  0x30   : > { %p1079_p0 = pnand %p729_p9, %p36_p13  ;;  %s1086_s27 = scalar_lea.hbm %s1216_s0, %s705_s25 }
  0x31   : > { %s158_s30 = sshll.u32 %s150_s29, 4  ;;  %s841_s5 = scalar_lea.hbm %s1086_s27, 384  ;;  %s1088_s30 = int_to_ptr.vmem [resolvable:$true] %s158_s30 }
  0x32   : > { %p842_p11 = scmp.ne.s32.totalorder %s1086_s27, %s841_s5  ;;  %p843_p3 = pneg %p1079_p0 }
  0x33   : > { %p847_p10 = scmp.lt.u32.totalorder %s1086_s27, %s1216_s0  ;;  %p848_p1 = scmp.lt.u32.totalorder %s846_s8, %s841_s5 }
  0x34   : > { %p844_p5 = pnand %p843_p3, %p842_p11  ;;  %p850_p4 = scmp.lt.u32.totalorder %s841_s5, %s1086_s27 }
  0x35   : > { %p849_p2 = por %p848_p1, %p847_p10 }
  0x36   : > { %p845_p7 = pneg %p844_p5 }
  0x37   : > { %p851_p6 = por %p850_p4, %p849_p2 }
  0x39   : > { %p852_p9 = pnand %p851_p6, %p845_p7 }
  0x3b   : > { %855 = shalt.err (!%p852_p9)
}
  0x3c   : > { %s856_s21 = scalar_lea.vmem %s1088_s30, 384  ;;  %s944_s24 = smov [#allocation3]  }
  0x3d   : > { %p857_p12 = scmp.ne.s32.totalorder %s1088_s30, %s856_s21  ;;  %s861_s25 = sshll.u32 %s944_s24, 4  ;;  %s862_s25 = int_to_ptr.vmem [resolvable:$false] %s861_s25 }
  0x3e   : > { %s863_s22 = scalar_lea.vmem %s862_s25, 768  ;;  %p864_p5 = scmp.lt.s32.totalorder %s1088_s30, %s862_s25 }
  0x3f   : > { %p859_p13 = pnand %p857_p12, %p843_p3  ;;  %p865_p10 = scmp.lt.s32.totalorder %s863_s22, %s856_s21 }
  0x41   : > { %p860_p11 = pneg %p859_p13  ;;  %p866_p1 = por %p865_p10, %p864_p5 }
  0x43   : > { %p867_p2 = pnand %p866_p1, %p860_p11 }
  0x45   : > { %870 = shalt.err (!%p867_p2)
}
  0x46   : > { %723 = dma.hbm_to_vmem [thread:$0]  (!%p1079_p0), %s1086_s27, 384, %s1088_s30, %s147_s4  }
  0x47   : > { %p1234_p7 = scmp.ne.s32.totalorder %s1225_s20, 0 }
  0x48   : > { %s1118_s26 = sand.u32 (!%p1234_p7), 1, %s933_s13   ;;  %p1235_p3 = scmp.ne.s32.totalorder (!%p1234_p7), %s1223_s18, 0 }
  0x49   : > { %167 = sbr.rel (%p1234_p7) target bundleno = 787 (0x313), region = 32  ;;  %s170_s5 = scalar_lea.sflag (!%p1234_p7), [#allocation4], %s1118_s26 }
  0x4a   : > { %s706_s29 = smul.u32 (!%p1234_p7), 24, %s1118_s26 }
  0x4c   : > { %s173_s6 = scalar_lea.vmem (!%p1234_p7), [#allocation3], %s706_s29 }
  0x50   : > { %916 = dma.done.wait (%p1235_p3), %s170_s5, 384  }
  0x51   : > { %918 = vsyncadd (%p1235_p3), %s170_s5, 4294966912  ;;  %p1236_p0 = scmp.eq.s32.totalorder %s998_s16, 0 }
  0x53   : > { %920 = dma.done.wait (%p1236_p0), [#allocation7], 128   ;;  %p1237_p4 = pmov %p1236_p0 }
  0x54   : > { %v945_v0 = vmov 0.0|0.0   ;;  %v201_v1 = vld [vmem:[%s173_s6 + $0x8] sm:$0xff]  ;;  %v202_v2 = vld [vmem:[%s173_s6 + $0x10] sm:$0xff]  ;;  %s946_s20 = smov 126   ;;  %s947_s28 = smov 127   ;;  %v200_v4 = vld [vmem:[%s173_s6] sm:$0xff]  ;;  %v212_v6 = vlaneseq }
  0x55   : > { %922 = vsyncadd (%p1237_p4), [#allocation7], 4294967168  ;;  %692 = vmatprep.subr.bf16.mxu1 %v945_v0  ;;  %v781_v3 = vpack.i.bf16 %v202_v2, %v201_v1  ;;  %s948_s27 = smov 110   ;;  %s949_s18 = smov 108   ;;  %v951_v5 = vmov 0.0   ;;  %vm954_vm0 = vmmov 0  }
  0x56   : > { %s950_s30 = smov 109   ;;  %408 = vmatprep.mubr.f32.mxu0 %v951_v5  ;;  %s952_s4 = smov 91   ;;  %673 = vmatprep.mubr.msk.f32.mxu1 %vm954_vm0, %v951_v5  ;;  %v1136_v7 = vand.u32 127, %v212_v6  ;;  %vm340_vm9 = vcmask 588800  }
  0x57   : > { %782 = vrot.lane.b32.xlu1 %v781_v3, %s946_s20  ;;  %777 = vrot.lane.b32.xlu0 %v781_v3, %s947_s28  ;;  %s953_s7 = smov 92   ;;  %s955_s8 = smov 90  }
  0x58   : > { %vm214_vm1 = vcmp.lt.s32.totalorder %v1136_v7, 127  ;;  %vm240_vm2 = vcmp.lt.s32.totalorder %v1136_v7, 110  ;;  %vm227_vm3 = vcmp.lt.s32.totalorder %v1136_v7, 126  ;;  %vm266_vm4 = vcmp.lt.s32.totalorder %v1136_v7, 108  ;;  %s707_s21 = smul.u32 384, %s998_s16  ;;  %s199_s24 = scalar_lea.vmem [#allocation8], %s706_s29 }
  0x59   : > { %vm253_vm5 = vcmp.lt.s32.totalorder %v1136_v7, 109  ;;  %vm292_vm6 = vcmp.lt.s32.totalorder %v1136_v7, 91  ;;  %vm279_vm7 = vcmp.lt.s32.totalorder %v1136_v7, 92  ;;  %vm305_vm8 = vcmp.lt.s32.totalorder %v1136_v7, 90  ;;  %s553_s25 = sshll.u32 %s199_s24, 4  ;;  %s539_s16 = scalar_lea.sflag [#allocation5], %s1118_s26  ;;  %s1174_s25 = int_to_ptr.vmem [resolvable:$true] %s553_s25 }
  0x5a   : > { %s1172_s6 = scalar_lea.hbm %s1219_s3, %s707_s21  ;;  %s871_s29 = scalar_lea.vmem %s1174_s25, 384 }
  0x5b   : > { %787 = vrot.lane.b32.xlu1 %v781_v3, %s948_s27  ;;  %206 = vrot.lane.b32.xlu0 %v200_v4, %s947_s28  ;;  %p872_p6 = scmp.ne.s32.totalorder %s1174_s25, %s871_s29 }
  0x5d   : > { %p873_p9 = pnand %p872_p6, %p1069_p8 }
  0x5f   : > { %234 = vrot.lane.b32.xlu1 %v200_v4, %s948_s27  ;;  %221 = vrot.lane.b32.xlu0 %v200_v4, %s946_s20  ;;  %p874_p12 = pneg %p873_p9  ;;  %s956_s20 = smov [#allocation8]  }
  0x60   : > { %s875_s28 = sshll.u32 %s956_s20, 4  ;;  %s876_s28 = int_to_ptr.vmem [resolvable:$false] %s875_s28 }
  0x61   : > { %s877_s27 = scalar_lea.vmem %s876_s28, 768  ;;  %p878_p13 = scmp.lt.s32.totalorder %s1174_s25, %s876_s28 }
  0x62   : > { %p879_p11 = scmp.lt.s32.totalorder %s877_s27, %s871_s29 }
  0x63   : > { %797 = vrot.lane.b32.xlu1 %v781_v3, %s949_s18  ;;  %792 = vrot.lane.b32.xlu0 %v781_v3, %s950_s30 }
  0x64   : > { %p880_p5 = por %p879_p11, %p878_p13 }
  0x66   : > { %p881_p10 = pnand %p880_p5, %p874_p12 }
  0x67   : > { %260 = vrot.lane.b32.xlu1 %v200_v4, %s949_s18  ;;  %247 = vrot.lane.b32.xlu0 %v200_v4, %s950_s30 }
  0x6b   : > { %807 = vrot.lane.b32.xlu1 %v781_v3, %s952_s4  ;;  %802 = vrot.lane.b32.xlu0 %v781_v3, %s953_s7 }
  0x6f   : > { %286 = vrot.lane.b32.xlu1 %v200_v4, %s952_s4  ;;  %273 = vrot.lane.b32.xlu0 %v200_v4, %s953_s7 }
  0x73   : > { %303 = vrot.lane.b32.xlu1 %v202_v2, %s955_s8  ;;  %301 = vrot.lane.b32.xlu0 %v201_v1, %s955_s8 }
  0x77   : > { %299 = vrot.lane.b32.xlu0 %v200_v4, %s955_s8 }
  0xc9   : > { %v783_v8 = vpop.permute.xlu1 %782  ;;  %v778_v9 = vpop.permute.xlu0 %777 }
  0xca   : > { %v780_v10 = vunpack.i.h.bf16 %v778_v9  ;;  %v779_v11 = vunpack.i.l.bf16 %v778_v9  ;;  %v785_v12 = vunpack.i.h.bf16 %v783_v8  ;;  %v784_v13 = vunpack.i.l.bf16 %v783_v8 }
  0xcc   : > { %v215_v14 = vsel %vm214_vm1, %v779_v11, %v780_v10  ;;  %v228_v24 = vsel %vm227_vm3, %v784_v13, %v785_v12 }
  0xcd   : > { %v788_v15 = vpop.permute.xlu1 %787  ;;  %v207_v16 = vpop.permute.xlu0 %206  ;;  %v676_v17 = vpack.c.bf16 %v215_v14, %v201_v1 }
  0xce   : > { %v790_v18 = vunpack.i.h.bf16 %v788_v15  ;;  %v789_v19 = vunpack.i.l.bf16 %v788_v15  ;;  %v216_v20 = vsel %vm214_vm1, %v207_v16, %v779_v11  ;;  %v217_v21 = vsel %vm214_vm1, %v780_v10, %v207_v16  ;;  %v485_v16 = vld [vmem:[%s1218_s2] sm:$0x7] }
  0xcf   : > { %677 = vmatprep.subr.bf16.mxu0 %v676_v17  ;;  %v678_v22 = vpack.c.bf16 %v216_v20, %v200_v4  ;;  %v693_v23 = vpack.c.bf16 %v217_v21, %v202_v2  ;;  %v488_v15 = vshrl.u32 %v212_v6, 7 }
  0xd0   : > { %v241_v25 = vsel %vm240_vm2, %v789_v19, %v790_v18 }
  0xd1   : > { %v235_v26 = vpop.permute.xlu1 %234  ;;  %679 = vmatpush1.bf16.msra.mxu0 %v678_v22  ;;  %694 = vmatpush3.bf16.msra.mxu1 %v693_v23  ;;  %v222_v27 = vpop.permute.xlu0 %221  ;;  %v680_v28 = vpack.c.bf16 %v241_v25, %v228_v24  ;;  %v489_v7 = vsub.s32 0, %v488_v15  ;;  %v493_v17 = vsub.s32 1, %v488_v15 }
  0xd2   : > { %v242_v29 = vsel %vm240_vm2, %v235_v26, %v789_v19  ;;  %v243_v30 = vsel %vm240_vm2, %v790_v18, %v235_v26  ;;  %v229_v31 = vsel %vm227_vm3, %v222_v27, %v784_v13  ;;  %v230_v32 = vsel %vm227_vm3, %v785_v12, %v222_v27  ;;  %695 = vmatprep.subr.bf16.mxu1 %v945_v0  ;;  %v312_v12 = vld [vmem:[#allocation6] sm:$0xff] }
  0xd3   : > { %v682_v33 = vpack.c.bf16 %v242_v29, %v229_v31  ;;  %v696_v34 = vpack.c.bf16 %v243_v30, %v230_v32  ;;  %681 = vmatprep.subr.bf16.mxu0 %v680_v28  ;;  %v497_v18 = vsub.s32 2, %v488_v15  ;;  %v494_v19 = vrot.slane %v485_v16, %v493_v17 }
  0xd5   : > { %v798_v35 = vpop.permute.xlu1 %797  ;;  %683 = vmatpush1.bf16.msra.mxu0 %v682_v33  ;;  %697 = vmatpush3.bf16.msra.mxu1 %v696_v34  ;;  %v793_v36 = vpop.permute.xlu0 %792  ;;  %v498_v20 = vrot.slane %v485_v16, %v497_v18 }
  0xd6   : > { %v800_v37 = vunpack.i.h.bf16 %v798_v35  ;;  %v799_v38 = vunpack.i.l.bf16 %v798_v35  ;;  %v795_v39 = vunpack.i.h.bf16 %v793_v36  ;;  %v794_v40 = vunpack.i.l.bf16 %v793_v36  ;;  %698 = vmatprep.subr.bf16.mxu1 %v945_v0 }
  0xd8   : > { %v254_v41 = vsel %vm253_vm5, %v794_v40, %v795_v39  ;;  %v267_v42 = vsel %vm266_vm4, %v799_v38, %v800_v37 }
  0xd9   : > { %v261_v43 = vpop.permute.xlu1 %260  ;;  %v248_v44 = vpop.permute.xlu0 %247  ;;  %v684_v45 = vpack.c.bf16 %v267_v42, %v254_v41 }
  0xda   : > { %v268_v46 = vsel %vm266_vm4, %v261_v43, %v799_v38  ;;  %v269_v47 = vsel %vm266_vm4, %v800_v37, %v261_v43  ;;  %v255_v48 = vsel %vm253_vm5, %v248_v44, %v794_v40  ;;  %v256_v49 = vsel %vm253_vm5, %v795_v39, %v248_v44 }
  0xdb   : > { %v686_v50 = vpack.c.bf16 %v268_v46, %v255_v48  ;;  %v699_v51 = vpack.c.bf16 %v269_v47, %v256_v49  ;;  %685 = vmatprep.subr.bf16.mxu0 %v684_v45 }
  0xdd   : > { %v808_v52 = vpop.permute.xlu1 %807  ;;  %v803_v53 = vpop.permute.xlu0 %802  ;;  %687 = vmatpush1.bf16.msra.mxu0 %v686_v50  ;;  %700 = vmatpush3.bf16.msra.mxu1 %v699_v51 }
  0xde   : > { %v810_v54 = vunpack.i.h.bf16 %v808_v52  ;;  %v809_v55 = vunpack.i.l.bf16 %v808_v52  ;;  %v805_v56 = vunpack.i.h.bf16 %v803_v53  ;;  %v804_v57 = vunpack.i.l.bf16 %v803_v53  ;;  %701 = vmatprep.subr.bf16.mxu1 %v945_v0 }
  0xe0   : > { %v280_v58 = vsel %vm279_vm7, %v804_v57, %v805_v56  ;;  %v293_v59 = vsel %vm292_vm6, %v809_v55, %v810_v54 }
  0xe1   : > { %v287_v60 = vpop.permute.xlu1 %286  ;;  %v274_v61 = vpop.permute.xlu0 %273  ;;  %v688_v62 = vpack.c.bf16 %v293_v59, %v280_v58 }
  0xe2   : > { %v294_v63 = vsel %vm292_vm6, %v287_v60, %v809_v55  ;;  %v295_v1 = vsel %vm292_vm6, %v810_v54, %v287_v60  ;;  %v281_v2 = vsel %vm279_vm7, %v274_v61, %v804_v57  ;;  %v282_v3 = vsel %vm279_vm7, %v805_v56, %v274_v61 }
  0xe3   : > { %v690_v4 = vpack.c.bf16 %v294_v63, %v281_v2  ;;  %v702_v8 = vpack.c.bf16 %v295_v1, %v282_v3  ;;  %689 = vmatprep.subr.bf16.mxu0 %v688_v62 }
  0xe5   : > { %v304_v9 = vpop.permute.xlu1 %303  ;;  %v302_v10 = vpop.permute.xlu0 %301  ;;  %691 = vmatpush1.bf16.msra.mxu0 %v690_v4  ;;  %703 = vmatpush3.bf16.msra.mxu1 %v702_v8 }
  0xe6   : > { %v306_v11 = vsel %vm305_vm8, %v302_v10, %v304_v9  ;;  %671 = vmatprep.subr.mxu1 %v951_v5  ;;  %v490_v5 = vrot.slane %v485_v16, %v489_v7 }
  0xe7   : > { %360 = vmatprep.subr.mxu0 %v306_v11 }
  0xe9   : > { %v300_v0 = vpop.permute.xlu0 %299 }
  0xea   : > { %v307_v13 = vsel %vm305_vm8, %v300_v0, %v302_v10  ;;  %v308_v14 = vsel %vm305_vm8, %v304_v9, %v300_v0 }
  0xeb   : > { %361 = vmatpush1.msra.mxu0 %v307_v13  ;;  %672 = vmatpush3.msra.mxu1 %v308_v14 }
  0xec   : > { %640 = vmatmul.mubr.msk.f32.vlgmr.msra.gmra.mrb[0].mxu0 %vm340_vm9, %v312_v12  ;;  %674 = vmatmul.mubr.msk.f32.vlgmr.msra.gmra.mrb[0].mxu1 %vm340_vm9, %v312_v12 }
 0x1bf   : > { %v410_v21 = vpop.f32.mrb[0].mxu0  ;;  %v481_v22 = vpop.f32.mrb[0].mxu1 }
 0x1c0   : > { %v502_v23 = vmul.f32 %v490_v5, %v410_v21  ;;  %v412_v24 = vpop.f32.mrb[1].mxu0  ;;  %v675_v25 = vpop.f32.mrb[1].mxu1  ;;  %v504_v27 = vmul.f32 %v498_v20, %v481_v22 }
 0x1c1   : > { %v503_v26 = vmul.f32 %v494_v19, %v412_v24 }
 0x1c3   : > { %v505_v28 = vadd.f32 %v503_v26, %v502_v23 }
 0x1c5   : > { %v506_v29 = vadd.f32 %v505_v28, %v504_v27 }
 0x1c7   : > { %507 = vadd.xlane.f32.xlu1 %v506_v29 }
 0x254   : > { %v508_v6 = vpop.xlane.xlu1 %507 }
 0x255   : > { %v509_v30 = vmul.f32 0.00390625, %v508_v6 }
 0x257   : > { %v510_v31 = vsub.f32 %v410_v21, %v509_v30  ;;  %v511_v32 = vsub.f32 %v412_v24, %v509_v30  ;;  %v512_v33 = vsub.f32 %v481_v22, %v509_v30 }
 0x259   : > { %v513_v34 = vmul.f32 %v510_v31, %v510_v31  ;;  %v514_v35 = vmul.f32 %v511_v32, %v511_v32  ;;  %v515_v36 = vmul.f32 %v512_v33, %v512_v33 }
 0x25b   : > { %v516_v37 = vmul.f32 %v513_v34, %v490_v5  ;;  %v517_v38 = vmul.f32 %v514_v35, %v494_v19  ;;  %v518_v39 = vmul.f32 %v515_v36, %v498_v20 }
 0x25d   : > { %v519_v40 = vadd.f32 %v517_v38, %v516_v37 }
 0x25f   : > { %v520_v41 = vadd.f32 %v519_v40, %v518_v39 }
 0x261   : > { %521 = vadd.xlane.f32.xlu0 %v520_v41 }
 0x2ee   : > { %v522_v42 = vpop.xlane.xlu0 %521 }
 0x2ef   : > { %v523_v43 = vmul.f32 0.00390625, %v522_v42 }
 0x2f1   : > { %v524_v44 = vadd.f32 1e-05, %v523_v43 }
 0x2f3   : > { %811 = vrsqrt.f32 %v524_v44 }
 0x2fd   : > { %v812_v45 = vpop.eup %811 }
 0x2fe   : > { %v526_v46 = vmul.f32 %v812_v45, %v510_v31  ;;  %v527_v47 = vmul.f32 %v812_v45, %v511_v32  ;;  %v528_v48 = vmul.f32 %v812_v45, %v512_v33 }
 0x300   : > { %v529_v49 = vmax.f32 %v526_v46, 0.0  ;;  %v530_v50 = vmax.f32 %v527_v47, 0.0  ;;  %v531_v51 = vmax.f32 %v528_v48, 0.0 }
 0x302   : > { %v532_v52 = vmul.f32 %v529_v49, %v490_v5  ;;  %v533_v53 = vmul.f32 %v530_v50, %v494_v19  ;;  %v534_v54 = vmul.f32 %v531_v51, %v498_v20 }
 0x304   : > { %535 = vst [vmem:[%s199_s24] sm:$0xff] %v532_v52  ;;  %536 = vst [vmem:[%s199_s24 + $0x8] sm:$0xff] %v533_v53 }
 0x305   : > { %537 = vst [vmem:[%s199_s24 + $0x10] sm:$0xff] %v534_v54 }
 0x306   : > { %884 = shalt.err (!%p881_p10)
}
 0x307   : > { %s885_s26 = scalar_lea.hbm %s1172_s6, 384  ;;  %s889_s4 = scalar_lea.hbm %s1219_s3, 768 }
 0x308   : > { %p886_p1 = scmp.ne.s32.totalorder %s1172_s6, %s885_s26  ;;  %p890_p3 = scmp.lt.u32.totalorder %s1172_s6, %s1219_s3 }
 0x309   : > { %p891_p0 = scmp.lt.u32.totalorder %s889_s4, %s885_s26  ;;  %p893_p6 = scmp.lt.u32.totalorder %s885_s26, %s1172_s6 }
 0x30a   : > { %p887_p2 = pnand %p886_p1, %p1069_p8 }
 0x30b   : > { %p892_p4 = por %p891_p0, %p890_p3 }
 0x30c   : > { %p888_p7 = pneg %p887_p2 }
 0x30d   : > { %p894_p9 = por %p893_p6, %p892_p4 }
 0x30f   : > { %p895_p12 = pnand %p894_p9, %p888_p7 }
 0x311   : > { %898 = shalt.err (!%p895_p12)
}
 0x312   : > { %714 = dma.vmem_to_hbm [thread:$0]  (%p1069_p8), %s1174_s25, 384, %s1172_s6, %s539_s16  }
 0x313 PF: > { %s565_s9 = sand.u32 1, %s929_s12   ;;  %p1238_p13 = scmp.ne.s32.totalorder %s1224_s19, 0 }
 0x314   : > { %p1239_p11 = scmp.ge.s32.totalorder %s941_s15, 2  ;;  %s566_s10 = scalar_lea.sflag [#allocation5], %s565_s9 }
 0x316   : > { %p725_p5 = pnand %p1239_p11, %p1238_p13 }
 0x318   : > { %924 = dma.done.wait (!%p725_p5), %s566_s10, 384  }
 0x319   : > { %926 = vsyncadd (!%p725_p5), %s566_s10, 4294966912  ;;  %p17_p10 = scmp.ge.s32.totalorder %s1025_s23, 4   ;;  %s1240_s12 = smov %s933_s13 }
 0x31a   : > { %s1241_s13 = smov %s937_s14  ;;  %s1242_s14 = smov %s1061_s11 }
 0x31b   : > { %s1243_s15 = smov %s1025_s23  ;;  %19 = sbr.rel (!%p17_p10) target bundleno = 6 (0x6), region = 81 }
 0x322   :  { %571 = vsyncpa [#allocation4], 1 }
 0x323   :  { %573 = vsyncpa [#allocation4 + $0x1], 1 }
 0x324   :  { %574 = vsyncpa [#allocation7], 1 }
 0x325   :  { %575 = vsyncpa [#allocation5], 1 }
 0x326   :  { %577 = vsyncpa [#allocation5 + $0x1], 1 }

</bundles_post_ra>
